<compile_context>
chip_gen: v6e
topology: v6e:2x2x1
jax: 0.10.0
libtpu: 0.0.40
codegen_flags: <defaults>
</compile_context>

<pallas_src>
import functools

import jax
import jax.numpy as jnp
from jax.experimental import pallas as pl
from jax.experimental.pallas import tpu as pltpu

EPS = 1e-5
_VMEM_LIMIT = 32 * 1024 * 1024  # safe on v5e/v6e (128 MiB) and v7x (64 MiB)


def bn_relu_fused_kernel(x_ref, g_ref, b_ref, o_ref, *, inv_count):
    """One grid step owns all data for its channel tile.

    x_ref/o_ref: (N, C_TILE, HW); g_ref/b_ref: (C_TILE, 1).
    Computes per-channel batch stats, fuses them into scale/shift, and writes
    y = max(x*scale + shift, 0) in the same step.
    """
    x = x_ref[...].astype(jnp.float32)                       # (N, C_TILE, HW)

    # Per-channel mean over (N, HW); data is VMEM-resident, so a second,
    # centered sweep for the variance is cheap and numerically robust.
    mean = jnp.sum(x, axis=(0, 2), keepdims=True) * inv_count   # (1, C_TILE, 1)
    centered = x - mean
    var = jnp.sum(centered * centered, axis=(0, 2), keepdims=True) * inv_count

    inv_std = jax.lax.rsqrt(var + EPS)                        # (1, C_TILE, 1)
    # (C_TILE, 1) broadcasts cleanly against (1, C_TILE, 1).
    scale = g_ref[...] * inv_std                              # (1, C_TILE, 1)
    shift = b_ref[...] - mean * scale                         # (1, C_TILE, 1)

    y = x * scale + shift
    o_ref[...] = jnp.maximum(y, 0.0).astype(o_ref.dtype)


def _pick_c_tile(C, N, HW, bytes_per_elem=4, budget=2 * 1024 * 1024):
    """Largest channel tile that (a) keeps the (N, c_tile, HW) block within a
    conservative per-block VMEM budget and (b) leaves >= 4 grid steps so both
    v7x TensorCores retain pipelined work.  Falls back gracefully."""
    candidates = [t for t in (256, 128, 64, 32, 16, 8) if C % t == 0]
    if not candidates:
        candidates = [C]
    fitting = [t for t in candidates if N * t * HW * bytes_per_elem <= budget]
    if not fitting:
        fitting = [min(candidates)]
    four_step = [t for t in fitting if C // t >= 4]
    return max(four_step) if four_step else max(fitting)


def batchnorm_relu(x_nchw, gamma, beta):
    """Training-mode BatchNorm2d + ReLU.  x_nchw: (N, C, H, W); gamma/beta: (C,)."""
    N, C, H, W = x_nchw.shape
    HW = H * W
    c_tile = _pick_c_tile(C, N, HW)
    n_c = C // c_tile
    inv_count = 1.0 / float(N * HW)

    # Free reshape: channels land on the sublane axis, spatial on the lane axis.
    x3 = x_nchw.reshape(N, C, HW)
    g2d = gamma.reshape(C, 1).astype(jnp.float32)
    b2d = beta.reshape(C, 1).astype(jnp.float32)

    out3 = pl.pallas_call(
        functools.partial(bn_relu_fused_kernel, inv_count=inv_count),
        out_shape=jax.ShapeDtypeStruct((N, C, HW), x_nchw.dtype),
        grid=(n_c,),
        in_specs=[
            pl.BlockSpec((N, c_tile, HW), lambda c: (0, c, 0)),
            pl.BlockSpec((c_tile, 1), lambda c: (c, 0)),
            pl.BlockSpec((c_tile, 1), lambda c: (c, 0)),
        ],
        out_specs=pl.BlockSpec((N, c_tile, HW), lambda c: (0, c, 0)),
        compiler_params=pltpu.CompilerParams(
            dimension_semantics=("parallel",),
            vmem_limit_bytes=_VMEM_LIMIT,
        ),
    )(x3, g2d, b2d)

    return out3.reshape(N, C, H, W)


def reference(x_nchw, gamma, beta):
    mean = jnp.mean(x_nchw, axis=(0, 2, 3), keepdims=True)
    var = jnp.mean((x_nchw - mean) ** 2, axis=(0, 2, 3), keepdims=True)
    y = (x_nchw - mean) / jnp.sqrt(var + EPS)
    y = y * gamma.reshape(1, -1, 1, 1) + beta.reshape(1, -1, 1, 1)
    return jnp.maximum(y, 0.0)


if __name__ == "__main__":
    key = jax.random.PRNGKey(0)
    # Shape from the module spec: x201 = torch.randn([1, 512, 14, 14]).
    N, C, H, W = 1, 512, 14, 14
    kx, kg, kb = jax.random.split(key, 3)
    x = jax.random.normal(kx, (N, C, H, W), dtype=jnp.float32)

    # PyTorch BatchNorm2d default init is weight=1, bias=0; perturb slightly
    # (deterministically) so the affine path is actually exercised.
    gamma = 1.0 + 0.1 * jax.random.normal(kg, (C,), dtype=jnp.float32)
    beta = 0.1 * jax.random.normal(kb, (C,), dtype=jnp.float32)

    out = batchnorm_relu(x, gamma, beta)
    out = jax.block_until_ready(out)

    ref = reference(x, gamma, beta)
    assert out.shape == (N, C, H, W)
    assert jnp.allclose(out, ref, atol=1e-4, rtol=1e-4), "mismatch vs reference"

    print("KERNEL_OK")
</pallas_src>

<mosaic_0001>
module attributes {stable_mosaic.version = 11 : i64} {
  func.func @bn_relu_fused_kernel(%arg0: i32, %arg1: memref<1x128x196xf32, #tpu.memory_space<vmem>>, %arg2: memref<128x1xf32, #tpu.memory_space<vmem>>, %arg3: memref<128x1xf32, #tpu.memory_space<vmem>>, %arg4: memref<1x128x196xf32, #tpu.memory_space<vmem>>) attributes {dimension_semantics = [#tpu.dimension_semantics<parallel>], iteration_bounds = array<i64: 4>, scalar_prefetch = 0 : i64, scratch_operands = 0 : i64, tpu.core_type = #tpu.core_type<tc>, window_params = [{transform_indices = @transform_0, window_bounds = array<i64: 1, 128, 196>}, {transform_indices = @transform_1, window_bounds = array<i64: 128, 1>}, {transform_indices = @transform_2, window_bounds = array<i64: 128, 1>}, {transform_indices = @transform_3, window_bounds = array<i64: 1, 128, 196>}]} {
    %c0 = arith.constant 0 : index
    %c0_0 = arith.constant 0 : index
    %c0_1 = arith.constant 0 : index
    %0 = vector.load %arg1[%c0, %c0_0, %c0_1] : memref<1x128x196xf32, #tpu.memory_space<vmem>>, vector<1x128x196xf32>
    %cst = arith.constant dense<0.000000e+00> : vector<128xf32>
    %1 = vector.multi_reduction <add>, %0, %cst [0, 2] : vector<1x128x196xf32> to vector<128xf32>
    %2 = vector.shape_cast %1 : vector<128xf32> to vector<1x128x1xf32>
    %cst_2 = arith.constant 0.00510204071 : f32
    %3 = vector.broadcast %cst_2 : f32 to vector<1x128x1xf32>
    %4 = arith.mulf %2, %3 : vector<1x128x1xf32>
    %5 = vector.broadcast %4 : vector<1x128x1xf32> to vector<1x128x196xf32>
    %6 = arith.subf %0, %5 : vector<1x128x196xf32>
    %7 = arith.mulf %6, %6 : vector<1x128x196xf32>
    %cst_3 = arith.constant dense<0.000000e+00> : vector<128xf32>
    %8 = vector.multi_reduction <add>, %7, %cst_3 [0, 2] : vector<1x128x196xf32> to vector<128xf32>
    %9 = vector.shape_cast %8 : vector<128xf32> to vector<1x128x1xf32>
    %cst_4 = arith.constant 0.00510204071 : f32
    %10 = vector.broadcast %cst_4 : f32 to vector<1x128x1xf32>
    %11 = arith.mulf %9, %10 : vector<1x128x1xf32>
    %cst_5 = arith.constant 9.99999974E-6 : f32
    %12 = vector.broadcast %cst_5 : f32 to vector<1x128x1xf32>
    %13 = arith.addf %11, %12 : vector<1x128x1xf32>
    %14 = math.rsqrt %13 : vector<1x128x1xf32>
    %c0_6 = arith.constant 0 : index
    %c0_7 = arith.constant 0 : index
    %15 = vector.load %arg2[%c0_6, %c0_7] : memref<128x1xf32, #tpu.memory_space<vmem>>, vector<128x1xf32>
    %16 = vector.shape_cast %15 : vector<128x1xf32> to vector<1x128x1xf32>
    %17 = arith.mulf %16, %14 : vector<1x128x1xf32>
    %c0_8 = arith.constant 0 : index
    %c0_9 = arith.constant 0 : index
    %18 = vector.load %arg3[%c0_8, %c0_9] : memref<128x1xf32, #tpu.memory_space<vmem>>, vector<128x1xf32>
    %19 = arith.mulf %4, %17 : vector<1x128x1xf32>
    %20 = vector.shape_cast %18 : vector<128x1xf32> to vector<1x128x1xf32>
    %21 = arith.subf %20, %19 : vector<1x128x1xf32>
    %22 = vector.broadcast %17 : vector<1x128x1xf32> to vector<1x128x196xf32>
    %23 = arith.mulf %0, %22 : vector<1x128x196xf32>
    %24 = vector.broadcast %21 : vector<1x128x1xf32> to vector<1x128x196xf32>
    %25 = arith.addf %23, %24 : vector<1x128x196xf32>
    %cst_10 = arith.constant 0.000000e+00 : f32
    %26 = vector.broadcast %cst_10 : f32 to vector<1x128x196xf32>
    %27 = arith.maximumf %25, %26 : vector<1x128x196xf32>
    %c0_11 = arith.constant 0 : index
    %c0_12 = arith.constant 0 : index
    %c0_13 = arith.constant 0 : index
    %28 = vector.load %arg4[%c0_11, %c0_12, %c0_13] : memref<1x128x196xf32, #tpu.memory_space<vmem>>, vector<1x128x196xf32>
    tpu.vector_store %arg4[%c0_11, %c0_12, %c0_13], %27 {strides = array<i32>} : memref<1x128x196xf32, #tpu.memory_space<vmem>>, vector<1x128x196xf32>,
    return
  }
  func.func @transform_0(%arg0: i32) -> (i32, i32, i32) {
    %c0_i32 = arith.constant 0 : i32
    %c0_i32_0 = arith.constant 0 : i32
    %c0_i32_1 = arith.constant 0 : i32
    return %c0_i32, %arg0, %c0_i32_0 : i32, i32, i32
  }
  func.func @transform_1(%arg0: i32) -> (i32, i32) {
    %c0_i32 = arith.constant 0 : i32
    %c0_i32_0 = arith.constant 0 : i32
    return %arg0, %c0_i32 : i32, i32
  }
  func.func @transform_2(%arg0: i32) -> (i32, i32) {
    %c0_i32 = arith.constant 0 : i32
    %c0_i32_0 = arith.constant 0 : i32
    return %arg0, %c0_i32 : i32, i32
  }
  func.func @transform_3(%arg0: i32) -> (i32, i32, i32) {
    %c0_i32 = arith.constant 0 : i32
    %c0_i32_0 = arith.constant 0 : i32
    %c0_i32_1 = arith.constant 0 : i32
    return %c0_i32, %arg0, %c0_i32_0 : i32, i32, i32
  }
}

</mosaic_0001>

<bundles_post_ra>
// kernel: tpu_custom_call.1
= control target key start
LH: loop header
LB: loop body
LE: loop exit
PB: predicated region body
PF: predicated region fallthrough
CT: control target
= control target key end

     0   :  { %s1053_s12 = smov 0   ;;  %s1536_s0 = inlined_call_operand.vmem [shape: f32[1,512,196], index: 0, kind: input, shape index: {}]   ;;  %s1537_s1 = inlined_call_operand.vmem [shape: f32[512,1], index: 1, kind: input, shape index: {}]   ;;  %s1538_s2 = inlined_call_operand.vmem [shape: f32[512,1], index: 2, kind: input, shape index: {}]   ;;  %s1539_s3 = inlined_call_operand.vmem [shape: f32[1,512,196], index: 3, kind: output, shape index: {}]  }
   0x1 LB: > { %s962_s13 = sadd.s32 4294967295, %s1030_s12   ;;  %p966_p0 = scmp.ge.s32.totalorder %s1030_s12, 1  ;;  %s1030_s12 = sphi %s1053_s12, %s13_s12  }
   0x2   : > { %p161_p1 = scmp.lt.s32.totalorder %s1030_s12, 5 }
   0x4   : > { %p162_p2 = pnand %p966_p0, %p161_p1 }
   0x6   : > { %165 = sbr.rel (%p162_p2) target bundleno = 531 (0x213), region = 32 }
   0xb   : > { %s967_s14 = sshll.u32 %s962_s13, 4  ;;  %vm255_vm0 = vcmask 556032  }
   0xc   : > { %p198_p3 = scmp.lt.s32.totalorder %s967_s14, 63 }
   0xe   : > { %s1574_s14 = smov (!%p198_p3, %s967_s14), 63 }
   0xf   : > { %s979_s15 = sshll.u32 %s1574_s14, 4  ;;  %s971_s19 = sshll.u32 %s1574_s14, 3 }
  0x10   : > { %s1069_s18 = scalar_lea.vmem %s1536_s0, %s979_s15  ;;  %s1333_s22 = scalar_lea.vmem %s1537_s1, %s971_s19 }
  0x11   : > { %v1072_v0 = vld [vmem:[%s1069_s18] sm:$0xff]  ;;  %v1075_v1 = vld [vmem:[%s1069_s18 + $0x8] sm:$0xff]  ;;  %v1086_v5 = vld [vmem:[%s1069_s18 + $0x10] sm:$0xff]  ;;  %s1368_s25 = scalar_lea.vmem %s1538_s2, %s971_s19  ;;  %s1431_s28 = scalar_lea.vmem %s1539_s3, %s979_s15 }
  0x12   : > { %v1078_v2 = vld [vmem:[%s1069_s18 + $0x20] sm:$0xff]  ;;  %v256_v3 = vsel %vm255_vm0, %v1075_v1, 0.0  ;;  %v1083_v4 = vld [vmem:[%s1069_s18 + $0x28] sm:$0xff]  ;;  %v1089_v6 = vld [vmem:[%s1069_s18 + $0x18] sm:$0xff] }
  0x13   : > { %v257_v7 = vadd.f32 %v256_v3, %v1072_v0  ;;  %v264_v8 = vsel %vm255_vm0, %v1083_v4, 0.0  ;;  %v260_v9 = vsel %vm255_vm0, %v1089_v6, 0.0  ;;  %v1097_v10 = vld [vmem:[%s1069_s18 + $0x30] sm:$0xff]  ;;  %v1100_v11 = vld [vmem:[%s1069_s18 + $0x38] sm:$0xff]  ;;  %v1106_v14 = vld [vmem:[%s1069_s18 + $0x48] sm:$0xff] }
  0x14   : > { %v265_v12 = vadd.f32 %v264_v8, %v1078_v2  ;;  %v268_v13 = vsel %vm255_vm0, %v1100_v11, 0.0  ;;  %v1109_v15 = vld [vmem:[%s1069_s18 + $0x58] sm:$0xff]  ;;  %v261_v16 = vadd.f32 %v260_v9, %v1086_v5  ;;  %v1114_v18 = vld [vmem:[%s1069_s18 + $0x40] sm:$0xff]  ;;  %v272_v19 = vsel %vm255_vm0, %v1106_v14, 0.0  ;;  %v1119_v20 = vld [vmem:[%s1069_s18 + $0x50] sm:$0xff] }
  0x15   : > { %258 = vadd.xlane.f32.xlu0 %v257_v7  ;;  %v269_v17 = vadd.f32 %v268_v13, %v1097_v10  ;;  %v276_v21 = vsel %vm255_vm0, %v1109_v15, 0.0  ;;  %v1124_v22 = vld [vmem:[%s1069_s18 + $0x68] sm:$0xff]  ;;  %v1127_v23 = vld [vmem:[%s1069_s18 + $0x78] sm:$0xff]  ;;  %v273_v24 = vadd.f32 %v272_v19, %v1114_v18  ;;  %v1132_v26 = vld [vmem:[%s1069_s18 + $0x60] sm:$0xff] }
  0x16   : > { %266 = vadd.xlane.f32.xlu1 %v265_v12  ;;  %v277_v25 = vadd.f32 %v276_v21, %v1119_v20  ;;  %v280_v27 = vsel %vm255_vm0, %v1124_v22, 0.0  ;;  %v1137_v28 = vld [vmem:[%s1069_s18 + $0x70] sm:$0xff]  ;;  %v284_v29 = vsel %vm255_vm0, %v1127_v23, 0.0  ;;  %v1142_v30 = vld [vmem:[%s1069_s18 + $0x88] sm:$0xff]  ;;  %v1145_v31 = vld [vmem:[%s1069_s18 + $0x98] sm:$0xff] }
  0x17   : > { %1551 = vst [vmem:[#allocation2_spill] sm:$0xff] %v1142_v30  ;;  %v281_v32 = vadd.f32 %v280_v27, %v1132_v26  ;;  %v285_v33 = vadd.f32 %v284_v29, %v1137_v28  ;;  %v1150_v34 = vld [vmem:[%s1069_s18 + $0x80] sm:$0xff]  ;;  %v288_v35 = vsel %vm255_vm0, %v1142_v30, 0.0  ;;  %v1155_v36 = vld [vmem:[%s1069_s18 + $0x90] sm:$0xff]  ;;  %v292_v37 = vsel %vm255_vm0, %v1145_v31, 0.0  ;;  %v1160_v38 = vld [vmem:[%s1069_s18 + $0xa8] sm:$0xff] }
  0x18   : > { %1552 = vst [vmem:[#allocation3_spill] sm:$0xff] %v1150_v34  ;;  %1553 = vst [vmem:[#allocation4_spill] sm:$0xff] %v1160_v38  ;;  %v1163_v39 = vld [vmem:[%s1069_s18 + $0xb8] sm:$0xff]  ;;  %v289_v40 = vadd.f32 %v288_v35, %v1150_v34  ;;  %v293_v41 = vadd.f32 %v292_v37, %v1155_v36  ;;  %v1168_v42 = vld [vmem:[%s1069_s18 + $0xa0] sm:$0xff]  ;;  %v296_v43 = vsel %vm255_vm0, %v1160_v38, 0.0 }
  0x19   : > { %262 = vadd.xlane.f32.xlu0 %v261_v16  ;;  %1554 = vst [vmem:[#allocation5_spill] sm:$0xff] %v1168_v42  ;;  %v1173_v44 = vld [vmem:[%s1069_s18 + $0xb0] sm:$0xff]  ;;  %v300_v45 = vsel %vm255_vm0, %v1163_v39, 0.0  ;;  %v1178_v46 = vld [vmem:[%s1069_s18 + $0xc8] sm:$0xff]  ;;  %v1181_v47 = vld [vmem:[%s1069_s18 + $0xd8] sm:$0xff]  ;;  %v297_v48 = vadd.f32 %v296_v43, %v1168_v42 }
  0x1a   : > { %270 = vadd.xlane.f32.xlu1 %v269_v17  ;;  %1555 = vst [vmem:[#allocation6_spill] sm:$0xff] %v1178_v46  ;;  %1556 = vst [vmem:[#allocation7_spill] sm:$0xff] %v1181_v47  ;;  %v301_v49 = vadd.f32 %v300_v45, %v1173_v44  ;;  %v1186_v50 = vld [vmem:[%s1069_s18 + $0xc0] sm:$0xff]  ;;  %v304_v51 = vsel %vm255_vm0, %v1178_v46, 0.0  ;;  %v1191_v52 = vld [vmem:[%s1069_s18 + $0xd0] sm:$0xff]  ;;  %v308_v53 = vsel %vm255_vm0, %v1181_v47, 0.0 }
  0x1b   : > { %1557 = vst [vmem:[#allocation8_spill] sm:$0xff] %v1186_v50  ;;  %v1196_v54 = vld [vmem:[%s1069_s18 + $0xe8] sm:$0xff]  ;;  %v1199_v55 = vld [vmem:[%s1069_s18 + $0xf8] sm:$0xff]  ;;  %v305_v56 = vadd.f32 %v304_v51, %v1186_v50  ;;  %v309_v57 = vadd.f32 %v308_v53, %v1191_v52  ;;  %v1204_v58 = vld [vmem:[%s1069_s18 + $0xe0] sm:$0xff] }
  0x1c   : > { %1558 = vst [vmem:[#allocation9_spill] sm:$0xff] %v1196_v54  ;;  %1559 = vst [vmem:[#allocation10_spill] sm:$0xff] %v1199_v55  ;;  %v312_v59 = vsel %vm255_vm0, %v1196_v54, 0.0  ;;  %v1209_v60 = vld [vmem:[%s1069_s18 + $0xf0] sm:$0xff]  ;;  %v316_v61 = vsel %vm255_vm0, %v1199_v55, 0.0 }
  0x1d   : > { %274 = vadd.xlane.f32.xlu0 %v273_v24  ;;  %1560 = vst [vmem:[#allocation11_spill] sm:$0xff] %v1204_v58  ;;  %1561 = vst [vmem:[#allocation12_spill] sm:$0xff] %v1209_v60  ;;  %v313_v62 = vadd.f32 %v312_v59, %v1204_v58  ;;  %v317_v63 = vadd.f32 %v316_v61, %v1209_v60 }
  0x1e   : > { %278 = vadd.xlane.f32.xlu1 %v277_v25 }
  0x21   : > { %282 = vadd.xlane.f32.xlu0 %v281_v32 }
  0x22   : > { %286 = vadd.xlane.f32.xlu1 %v285_v33 }
  0x25   : > { %290 = vadd.xlane.f32.xlu0 %v289_v40 }
  0x26   : > { %294 = vadd.xlane.f32.xlu1 %v293_v41 }
  0x29   : > { %298 = vadd.xlane.f32.xlu0 %v297_v48 }
  0x2a   : > { %302 = vadd.xlane.f32.xlu1 %v301_v49 }
  0x2d   : > { %306 = vadd.xlane.f32.xlu0 %v305_v56 }
  0x2e   : > { %310 = vadd.xlane.f32.xlu1 %v309_v57 }
  0x31   : > { %314 = vadd.xlane.f32.xlu0 %v313_v62 }
  0x32   : > { %318 = vadd.xlane.f32.xlu1 %v317_v63 }
  0x9e   : > { %v259_v3 = vpop.xlane.xlu0 %258 }
  0x9f   : > { %v1215_v7 = vmul.f32 0.0051020407, %v259_v3  ;;  %v267_v8 = vpop.xlane.xlu1 %266 }
  0xa0   : > { %v1217_v9 = vmul.f32 0.0051020407, %v267_v8 }
  0xa1   : > { %v336_v12 = vsub.f32 %v1072_v0, %v1215_v7  ;;  %v337_v13 = vsub.f32 %v1075_v1, %v1215_v7 }
  0xa2   : > { %v263_v16 = vpop.xlane.xlu0 %262  ;;  %v340_v17 = vsub.f32 %v1078_v2, %v1217_v9  ;;  %v341_v19 = vsub.f32 %v1083_v4, %v1217_v9 }
  0xa3   : > { %v1227_v21 = vmul.f32 0.0051020407, %v263_v16  ;;  %v271_v24 = vpop.xlane.xlu1 %270  ;;  %v368_v25 = vmul.f32 %v336_v12, %v336_v12  ;;  %v369_v27 = vmul.f32 %v337_v13, %v337_v13 }
  0xa4   : > { %v1229_v29 = vmul.f32 0.0051020407, %v271_v24  ;;  %v372_v32 = vmul.f32 %v340_v17, %v340_v17  ;;  %v373_v33 = vmul.f32 %v341_v19, %v341_v19 }
  0xa5   : > { %v400_v35 = vsel %vm255_vm0, %v369_v27, 0.0  ;;  %v338_v37 = vsub.f32 %v1086_v5, %v1227_v21  ;;  %v339_v40 = vsub.f32 %v1089_v6, %v1227_v21 }
  0xa6   : > { %v275_v41 = vpop.xlane.xlu0 %274  ;;  %v401_v43 = vadd.f32 %v400_v35, %v368_v25  ;;  %v408_v45 = vsel %vm255_vm0, %v373_v33, 0.0  ;;  %v342_v48 = vsub.f32 %v1097_v10, %v1229_v29  ;;  %v343_v49 = vsub.f32 %v1100_v11, %v1229_v29 }
  0xa7   : > { %v1241_v51 = vmul.f32 0.0051020407, %v275_v41  ;;  %v279_v53 = vpop.xlane.xlu1 %278  ;;  %v370_v56 = vmul.f32 %v338_v37, %v338_v37  ;;  %v371_v57 = vmul.f32 %v339_v40, %v339_v40  ;;  %v409_v61 = vadd.f32 %v408_v45, %v372_v32 }
  0xa8   : > { %402 = vadd.xlane.f32.xlu0 %v401_v43  ;;  %v1243_v59 = vmul.f32 0.0051020407, %v279_v53  ;;  %v374_v62 = vmul.f32 %v342_v48, %v342_v48  ;;  %v375_v63 = vmul.f32 %v343_v49, %v343_v49 }
  0xa9   : > { %v404_v3 = vsel %vm255_vm0, %v371_v57, 0.0  ;;  %v344_v8 = vsub.f32 %v1114_v18, %v1241_v51  ;;  %v345_v12 = vsub.f32 %v1106_v14, %v1241_v51 }
  0xaa   : > { %v283_v13 = vpop.xlane.xlu0 %282  ;;  %v405_v16 = vadd.f32 %v404_v3, %v370_v56  ;;  %v412_v17 = vsel %vm255_vm0, %v375_v63, 0.0  ;;  %v346_v19 = vsub.f32 %v1119_v20, %v1243_v59  ;;  %v347_v24 = vsub.f32 %v1109_v15, %v1243_v59 }
  0xab   : > { %v1255_v25 = vmul.f32 0.0051020407, %v283_v13  ;;  %v287_v27 = vpop.xlane.xlu1 %286  ;;  %v376_v32 = vmul.f32 %v344_v8, %v344_v8  ;;  %v377_v33 = vmul.f32 %v345_v12, %v345_v12  ;;  %v413_v37 = vadd.f32 %v412_v17, %v374_v62 }
  0xac   : > { %410 = vadd.xlane.f32.xlu0 %v409_v61  ;;  %406 = vadd.xlane.f32.xlu1 %v405_v16  ;;  %v1257_v35 = vmul.f32 0.0051020407, %v287_v27  ;;  %v378_v40 = vmul.f32 %v346_v19, %v346_v19  ;;  %v379_v41 = vmul.f32 %v347_v24, %v347_v24 }
  0xad   : > { %v416_v43 = vsel %vm255_vm0, %v377_v33, 0.0  ;;  %v348_v45 = vsub.f32 %v1132_v26, %v1255_v25  ;;  %v349_v48 = vsub.f32 %v1124_v22, %v1255_v25 }
  0xae   : > { %v291_v49 = vpop.xlane.xlu0 %290  ;;  %v417_v53 = vadd.f32 %v416_v43, %v376_v32  ;;  %v420_v56 = vsel %vm255_vm0, %v379_v41, 0.0  ;;  %v350_v57 = vsub.f32 %v1137_v28, %v1257_v35  ;;  %v351_v61 = vsub.f32 %v1127_v23, %v1257_v35 }
  0xaf   : > { %v1269_v62 = vmul.f32 0.0051020407, %v291_v49  ;;  %v295_v63 = vpop.xlane.xlu1 %294  ;;  %v380_v3 = vmul.f32 %v348_v45, %v348_v45  ;;  %v381_v8 = vmul.f32 %v349_v48, %v349_v48  ;;  %v421_v13 = vadd.f32 %v420_v56, %v378_v40 }
  0xb0   : > { %414 = vadd.xlane.f32.xlu1 %v413_v37  ;;  %418 = vadd.xlane.f32.xlu0 %v417_v53  ;;  %v1271_v12 = vmul.f32 0.0051020407, %v295_v63  ;;  %v382_v16 = vmul.f32 %v350_v57, %v350_v57  ;;  %v383_v17 = vmul.f32 %v351_v61, %v351_v61 }
  0xb1   : > { %v424_v19 = vsel %vm255_vm0, %v381_v8, 0.0  ;;  %v352_v24 = vsub.f32 %v1150_v34, %v1269_v62  ;;  %v353_v27 = vsub.f32 %v1142_v30, %v1269_v62  ;;  %v520_v30 = vld [vmem:[%s1333_s22 + $0x40] sm:$0xff]  ;;  %v549_v34 = vld [vmem:[%s1368_s25 + $0x28] sm:$0xff] }
  0xb2   : > { %v299_v32 = vpop.xlane.xlu0 %298  ;;  %v425_v33 = vadd.f32 %v424_v19, %v380_v3  ;;  %v428_v41 = vsel %vm255_vm0, %v383_v17, 0.0  ;;  %v354_v37 = vsub.f32 %v1155_v36, %v1271_v12  ;;  %v355_v40 = vsub.f32 %v1145_v31, %v1271_v12 }
  0xb3   : > { %v1283_v43 = vmul.f32 0.0051020407, %v299_v32  ;;  %v303_v45 = vpop.xlane.xlu1 %302  ;;  %v384_v48 = vmul.f32 %v352_v24, %v352_v24  ;;  %v385_v49 = vmul.f32 %v353_v27, %v353_v27  ;;  %v429_v56 = vadd.f32 %v428_v41, %v382_v16 }
  0xb4   : > { %422 = vadd.xlane.f32.xlu1 %v421_v13  ;;  %426 = vadd.xlane.f32.xlu0 %v425_v33  ;;  %v1285_v53 = vmul.f32 0.0051020407, %v303_v45  ;;  %v386_v57 = vmul.f32 %v354_v37, %v354_v37  ;;  %v387_v61 = vmul.f32 %v355_v40, %v355_v40 }
  0xb5   : > { %v432_v63 = vsel %vm255_vm0, %v385_v49, 0.0  ;;  %v356_v3 = vsub.f32 %v1168_v42, %v1283_v43  ;;  %v357_v8 = vsub.f32 %v1160_v38, %v1283_v43  ;;  %v521_v42 = vld [vmem:[%s1333_s22 + $0x48] sm:$0xff] }
  0xb6   : > { %v307_v17 = vpop.xlane.xlu0 %306  ;;  %v433_v19 = vadd.f32 %v432_v63, %v384_v48  ;;  %v436_v24 = vsel %vm255_vm0, %v387_v61, 0.0  ;;  %v358_v13 = vsub.f32 %v1173_v44, %v1285_v53  ;;  %v359_v16 = vsub.f32 %v1163_v39, %v1285_v53 }
  0xb7   : > { %v1297_v27 = vmul.f32 0.0051020407, %v307_v17  ;;  %v311_v32 = vpop.xlane.xlu1 %310  ;;  %v388_v33 = vmul.f32 %v356_v3, %v356_v3  ;;  %v389_v41 = vmul.f32 %v357_v8, %v357_v8  ;;  %v437_v40 = vadd.f32 %v436_v24, %v386_v57 }
  0xb8   : > { %430 = vadd.xlane.f32.xlu1 %v429_v56  ;;  %434 = vadd.xlane.f32.xlu0 %v433_v19  ;;  %v1299_v37 = vmul.f32 0.0051020407, %v311_v32  ;;  %v390_v45 = vmul.f32 %v358_v13, %v358_v13  ;;  %v391_v48 = vmul.f32 %v359_v16, %v359_v16 }
  0xb9   : > { %v440_v49 = vsel %vm255_vm0, %v389_v41, 0.0  ;;  %v360_v61 = vsub.f32 %v1186_v50, %v1297_v27  ;;  %v361_v63 = vsub.f32 %v1178_v46, %v1297_v27 }
  0xba   : > { %v315_v17 = vpop.xlane.xlu0 %314  ;;  %v441_v38 = vadd.f32 %v440_v49, %v388_v33  ;;  %v444_v3 = vsel %vm255_vm0, %v391_v48, 0.0  ;;  %v362_v56 = vsub.f32 %v1191_v52, %v1299_v37  ;;  %v363_v57 = vsub.f32 %v1181_v47, %v1299_v37  ;;  %v526_v47 = vld [vmem:[%s1333_s22 + $0x70] sm:$0xff] }
  0xbb   : > { %v1311_v8 = vmul.f32 0.0051020407, %v315_v17  ;;  %v319_v19 = vpop.xlane.xlu1 %318  ;;  %v392_v24 = vmul.f32 %v360_v61, %v360_v61  ;;  %v393_v13 = vmul.f32 %v361_v63, %v361_v63  ;;  %v445_v32 = vadd.f32 %v444_v3, %v390_v45 }
  0xbc   : > { %438 = vadd.xlane.f32.xlu1 %v437_v40  ;;  %442 = vadd.xlane.f32.xlu0 %v441_v38  ;;  %v1313_v16 = vmul.f32 0.0051020407, %v319_v19  ;;  %v394_v41 = vmul.f32 %v362_v56, %v362_v56  ;;  %v395_v33 = vmul.f32 %v363_v57, %v363_v57 }
  0xbd   : > { %v448_v48 = vsel %vm255_vm0, %v393_v13, 0.0  ;;  %v364_v49 = vsub.f32 %v1204_v58, %v1311_v8  ;;  %v365_v46 = vsub.f32 %v1196_v54, %v1311_v8  ;;  %v514_v54 = vld [vmem:[%s1333_s22 + $0x10] sm:$0xff] }
  0xbe   : > { %v449_v17 = vadd.f32 %v448_v48, %v392_v24  ;;  %v452_v50 = vsel %vm255_vm0, %v395_v33, 0.0  ;;  %v366_v40 = vsub.f32 %v1209_v60, %v1313_v16  ;;  %v367_v38 = vsub.f32 %v1199_v55, %v1313_v16  ;;  %v525_v60 = vld [vmem:[%s1333_s22 + $0x68] sm:$0xff] }
  0xbf   : > { %v396_v45 = vmul.f32 %v364_v49, %v364_v49  ;;  %v397_v61 = vmul.f32 %v365_v46, %v365_v46  ;;  %v453_v63 = vadd.f32 %v452_v50, %v394_v41  ;;  %v1032_v33 = vmov 0  }
  0xc0   : > { %446 = vadd.xlane.f32.xlu1 %v445_v32  ;;  %450 = vadd.xlane.f32.xlu0 %v449_v17  ;;  %v398_v3 = vmul.f32 %v366_v40, %v366_v40  ;;  %v399_v56 = vmul.f32 %v367_v38, %v367_v38 }
  0xc1   : > { %v456_v57 = vsel %vm255_vm0, %v397_v61, 0.0  ;;  %990 = vset.pattern.permute.xlu0 %v1032_v33  ;;  %991 = vset.pattern.permute.xlu1 %v1032_v33 }
  0xc2   : > { %v457_v19 = vadd.f32 %v456_v57, %v396_v45  ;;  %v460_v24 = vsel %vm255_vm0, %v399_v56, 0.0 }
  0xc3   : > { %v461_v13 = vadd.f32 %v460_v24, %v398_v3 }
  0xc4   : > { %454 = vadd.xlane.f32.xlu1 %v453_v63  ;;  %458 = vadd.xlane.f32.xlu0 %v457_v19 }
  0xc8   : > { %462 = vadd.xlane.f32.xlu1 %v461_v13 }
 0x131   : > { %v403_v48 = vpop.xlane.xlu0 %402 }
 0x132   : > { %v464_v46 = vmul.f32 0.0051020407, %v403_v48  ;;  %v512_v48 = vld [vmem:[%s1333_s22] sm:$0xff] }
 0x134   : > { %v480_v32 = vadd.f32 1e-05, %v464_v46 }
 0x135   : > { %v407_v49 = vpop.xlane.xlu1 %406  ;;  %v411_v50 = vpop.xlane.xlu0 %410 }
 0x136   : > { %992 = vrsqrt.f32 %v480_v32  ;;  %v465_v41 = vmul.f32 0.0051020407, %v407_v49  ;;  %v466_v17 = vmul.f32 0.0051020407, %v411_v50 }
 0x138   : > { %v481_v40 = vadd.f32 1e-05, %v465_v41  ;;  %v482_v38 = vadd.f32 1e-05, %v466_v17 }
 0x139   : > { %v415_v45 = vpop.xlane.xlu1 %414  ;;  %v419_v61 = vpop.xlane.xlu0 %418 }
 0x13a   : > { %994 = vrsqrt.f32 %v481_v40  ;;  %v467_v63 = vmul.f32 0.0051020407, %v415_v45  ;;  %v468_v56 = vmul.f32 0.0051020407, %v419_v61  ;;  %v513_v40 = vld [vmem:[%s1333_s22 + $0x8] sm:$0xff] }
 0x13b   : > { %996 = vrsqrt.f32 %v482_v38 }
 0x13c   : > { %v483_v3 = vadd.f32 1e-05, %v467_v63  ;;  %v484_v24 = vadd.f32 1e-05, %v468_v56 }
 0x13d   : > { %v423_v57 = vpop.xlane.xlu1 %422  ;;  %v427_v19 = vpop.xlane.xlu0 %426 }
 0x13e   : > { %998 = vrsqrt.f32 %v483_v3  ;;  %v469_v13 = vmul.f32 0.0051020407, %v423_v57  ;;  %v470_v32 = vmul.f32 0.0051020407, %v427_v19 }
 0x13f   : > { %1000 = vrsqrt.f32 %v484_v24 }
 0x140   : > { %v485_v50 = vadd.f32 1e-05, %v469_v13  ;;  %v486_v61 = vadd.f32 1e-05, %v470_v32 }
 0x141   : > { %v431_v33 = vpop.xlane.xlu1 %430  ;;  %v435_v49 = vpop.xlane.xlu0 %434 }
 0x142   : > { %1002 = vrsqrt.f32 %v485_v50  ;;  %v471_v63 = vmul.f32 0.0051020407, %v431_v33 }
 0x143   : > { %v993_v46 = vpop.eup %992 }
 0x144   : > { %v1336_v41 = vmul.f32 %v993_v46, %v512_v48  ;;  %v472_v48 = vmul.f32 0.0051020407, %v435_v49  ;;  %v487_v46 = vadd.f32 1e-05, %v471_v63 }
 0x145   : > { %v439_v17 = vpop.xlane.xlu1 %438  ;;  %v443_v19 = vpop.xlane.xlu0 %442 }
 0x146   : > { %v473_v38 = vmul.f32 0.0051020407, %v439_v17  ;;  %594 = vperm.xlu0 %990, %v1336_v41  }
 0x147   : > { %v995_v45 = vpop.eup %994 }
 0x148   : > { %v489_v3 = vadd.f32 1e-05, %v473_v38  ;;  %v1340_v56 = vmul.f32 %v995_v45, %v513_v40  ;;  %v997_v57 = vpop.eup %996  ;;  %v515_v38 = vld [vmem:[%s1333_s22 + $0x18] sm:$0xff]  ;;  %v474_v45 = vmul.f32 0.0051020407, %v443_v19 }
 0x149   : > { %v447_v24 = vpop.xlane.xlu1 %446  ;;  %v1344_v32 = vmul.f32 %v997_v57, %v514_v54  ;;  %v451_v58 = vpop.xlane.xlu0 %450 }
 0x14a   : > { %1004 = vrsqrt.f32 %v489_v3  ;;  %v475_v13 = vmul.f32 0.0051020407, %v447_v24  ;;  %599 = vperm.xlu1 %991, %v1340_v56   ;;  %v488_v3 = vadd.f32 1e-05, %v472_v48  ;;  %v490_v57 = vadd.f32 1e-05, %v474_v45 }
 0x14b   : > { %1006 = vrsqrt.f32 %v486_v61  ;;  %v999_v33 = vpop.eup %998 }
 0x14c   : > { %v491_v17 = vadd.f32 1e-05, %v475_v13  ;;  %v531_v49 = vmul.f32 %v999_v33, %v515_v38  ;;  %v1001_v61 = vpop.eup %1000  ;;  %v516_v13 = vld [vmem:[%s1333_s22 + $0x20] sm:$0xff] }
 0x14d   : > { %v455_v50 = vpop.xlane.xlu1 %454  ;;  %v1349_v19 = vmul.f32 %v1001_v61, %v516_v13  ;;  %v459_v48 = vpop.xlane.xlu0 %458 }
 0x14e   : > { %1008 = vrsqrt.f32 %v491_v17  ;;  %v477_v40 = vmul.f32 0.0051020407, %v455_v50  ;;  %604 = vperm.xlu1 %991, %v1344_v32   ;;  %v476_v17 = vmul.f32 0.0051020407, %v451_v58  ;;  %v478_v45 = vmul.f32 0.0051020407, %v459_v48 }
 0x14f   : > { %1010 = vrsqrt.f32 %v487_v46  ;;  %v1003_v46 = vpop.eup %1002 }
 0x150   : > { %v493_v24 = vadd.f32 1e-05, %v477_v40  ;;  %v517_v40 = vld [vmem:[%s1333_s22 + $0x28] sm:$0xff]  ;;  %v492_v38 = vadd.f32 1e-05, %v476_v17  ;;  %v519_v17 = vld [vmem:[%s1333_s22 + $0x38] sm:$0xff] }
 0x151   : > { %v463_v63 = vpop.xlane.xlu1 %462  ;;  %v533_v58 = vmul.f32 %v1003_v46, %v517_v40  ;;  %v494_v13 = vadd.f32 1e-05, %v478_v45 }
 0x152   : > { %1012 = vrsqrt.f32 %v493_v24  ;;  %v479_v54 = vmul.f32 0.0051020407, %v463_v63  ;;  %609 = vperm.xlu1 %991, %v531_v49   ;;  %v523_v63 = vld [vmem:[%s1333_s22 + $0x58] sm:$0xff] }
 0x153   : > { %1014 = vrsqrt.f32 %v488_v3 }
 0x154   : > { %v495_v50 = vadd.f32 1e-05, %v479_v54  ;;  %v518_v54 = vld [vmem:[%s1333_s22 + $0x30] sm:$0xff] }
 0x156   : > { %1016 = vrsqrt.f32 %v495_v50  ;;  %614 = vperm.xlu1 %991, %v1349_v19  }
 0x157   : > { %v1005_v33 = vpop.eup %1004  ;;  %1018 = vrsqrt.f32 %v490_v57 }
 0x158   : > { %v537_v3 = vmul.f32 %v1005_v33, %v521_v42  ;;  %v1007_v24 = vpop.eup %1006  ;;  %1020 = vrsqrt.f32 %v492_v38  ;;  %v527_v33 = vld [vmem:[%s1333_s22 + $0x78] sm:$0xff] }
 0x159   : > { %v1356_v55 = vmul.f32 %v1007_v24, %v518_v54  ;;  %1022 = vrsqrt.f32 %v494_v13  ;;  %v545_v54 = vld [vmem:[%s1368_s25 + $0x8] sm:$0xff] }
 0x15a   : > { %639 = vperm.xlu0 %990, %v537_v3   ;;  %619 = vperm.xlu1 %991, %v533_v58  }
 0x15b   : > { %v1009_v61 = vpop.eup %1008 }
 0x15c   : > { %v539_v50 = vmul.f32 %v1009_v61, %v523_v63  ;;  %v1011_v57 = vpop.eup %1010  ;;  %v522_v61 = vld [vmem:[%s1333_s22 + $0x50] sm:$0xff] }
 0x15d   : > { %v535_v48 = vmul.f32 %v1011_v57, %v519_v17 }
 0x15e   : > { %649 = vperm.xlu0 %990, %v539_v50   ;;  %624 = vperm.xlu1 %991, %v1356_v55  }
 0x15f   : > { %v1013_v42 = vpop.eup %1012 }
 0x160   : > { %v541_v46 = vmul.f32 %v1013_v42, %v525_v60  ;;  %v1015_v40 = vpop.eup %1014  ;;  %v561_v60 = vmul.f32 %v1340_v56, %v1227_v21  ;;  %v547_v42 = vld [vmem:[%s1368_s25 + $0x18] sm:$0xff]  ;;  %v565_v21 = vmul.f32 %v533_v58, %v1243_v59 }
 0x161   : > { %v536_v63 = vmul.f32 %v1015_v40, %v520_v30  ;;  %v563_v30 = vmul.f32 %v531_v49, %v1229_v29  ;;  %v524_v40 = vld [vmem:[%s1333_s22 + $0x60] sm:$0xff]  ;;  %v567_v49 = vmul.f32 %v535_v48, %v1257_v35 }
 0x162   : > { %659 = vperm.xlu0 %990, %v541_v46   ;;  %629 = vperm.xlu1 %991, %v535_v48   ;;  %v577_v13 = vsub.f32 %v545_v54, %v561_v60  ;;  %v560_v60 = vmul.f32 %v1336_v41, %v1215_v7  ;;  %v551_v54 = vld [vmem:[%s1368_s25 + $0x38] sm:$0xff]  ;;  %v571_v41 = vmul.f32 %v539_v50, %v1285_v53 }
 0x163   : > { %v1017_v38 = vpop.eup %1016  ;;  %v583_v59 = vsub.f32 %v551_v54, %v567_v49  ;;  %v564_v48 = vmul.f32 %v1349_v19, %v1241_v51  ;;  %v568_v50 = vmul.f32 %v536_v63, %v1269_v62 }
 0x164   : > { %v1019_v45 = vpop.eup %1018  ;;  %v543_v24 = vmul.f32 %v1017_v38, %v527_v33  ;;  %v579_v33 = vsub.f32 %v547_v42, %v563_v30  ;;  %v562_v30 = vmul.f32 %v1344_v32, %v1217_v9  ;;  %v548_v42 = vld [vmem:[%s1368_s25 + $0x20] sm:$0xff]  ;;  %v573_v32 = vmul.f32 %v541_v46, %v1299_v37 }
 0x165   : > { %v538_v57 = vmul.f32 %v1019_v45, %v522_v61  ;;  %v1021_v17 = vpop.eup %1020  ;;  %v581_v45 = vsub.f32 %v549_v34, %v565_v21  ;;  %v544_v61 = vld [vmem:[%s1368_s25] sm:$0xff]  ;;  %v553_v34 = vld [vmem:[%s1368_s25 + $0x48] sm:$0xff]  ;;  %v559_v21 = vld [vmem:[%s1368_s25 + $0x78] sm:$0xff] }
 0x166   : > { %669 = vperm.xlu0 %990, %v543_v24   ;;  %634 = vperm.xlu1 %991, %v536_v63   ;;  %v540_v38 = vmul.f32 %v1021_v17, %v524_v40  ;;  %v1023_v56 = vpop.eup %1022  ;;  %v576_v58 = vsub.f32 %v544_v61, %v560_v60  ;;  %v555_v17 = vld [vmem:[%s1368_s25 + $0x58] sm:$0xff]  ;;  %v557_v40 = vld [vmem:[%s1368_s25 + $0x68] sm:$0xff]  ;;  %v575_v19 = vmul.f32 %v543_v24, %v1313_v16  ;;  %v556_v60 = vld [vmem:[%s1368_s25 + $0x60] sm:$0xff] }
 0x167   : > { %v542_v29 = vmul.f32 %v1023_v56, %v526_v47  ;;  %v546_v47 = vld [vmem:[%s1368_s25 + $0x10] sm:$0xff]  ;;  %v587_v9 = vsub.f32 %v555_v17, %v571_v41  ;;  %v589_v53 = vsub.f32 %v557_v40, %v573_v32  ;;  %v552_v56 = vld [vmem:[%s1368_s25 + $0x40] sm:$0xff] }
 0x168   : > { %v578_v35 = vsub.f32 %v546_v47, %v562_v30  ;;  %v591_v37 = vsub.f32 %v559_v21, %v575_v19  ;;  %v584_v46 = vsub.f32 %v552_v56, %v568_v50  ;;  %v572_v49 = vmul.f32 %v540_v38, %v1297_v27  ;;  %v558_v24 = vld [vmem:[%s1368_s25 + $0x70] sm:$0xff] }
 0x169   : > { %v574_v62 = vmul.f32 %v542_v29, %v1311_v8 }
 0x16a   : > { %711 = vperm.xlu0 %990, %v577_v13   ;;  %644 = vperm.xlu1 %991, %v538_v57   ;;  %v569_v13 = vmul.f32 %v537_v3, %v1271_v12  ;;  %v580_v12 = vsub.f32 %v548_v42, %v564_v48  ;;  %v566_v3 = vmul.f32 %v1356_v55, %v1255_v25  ;;  %v554_v25 = vld [vmem:[%s1368_s25 + $0x50] sm:$0xff] }
 0x16b   : > { %v570_v55 = vmul.f32 %v538_v57, %v1283_v43  ;;  %v588_v16 = vsub.f32 %v556_v60, %v572_v49  ;;  %v590_v63 = vsub.f32 %v558_v24, %v574_v62 }
 0x16c   : > { %v585_v7 = vsub.f32 %v553_v34, %v569_v13 }
 0x16e   : > { %721 = vperm.xlu0 %990, %v579_v33   ;;  %654 = vperm.xlu1 %991, %v540_v38   ;;  %v550_v33 = vld [vmem:[%s1368_s25 + $0x30] sm:$0xff] }
 0x16f   : > { %v582_v51 = vsub.f32 %v550_v33, %v566_v3 }
 0x172   : > { %731 = vperm.xlu0 %990, %v581_v45   ;;  %664 = vperm.xlu1 %991, %v542_v29   ;;  %v586_v45 = vsub.f32 %v554_v25, %v570_v55 }
 0x176   : > { %741 = vperm.xlu0 %990, %v583_v59   ;;  %706 = vperm.xlu1 %991, %v576_v58  }
 0x17a   : > { %751 = vperm.xlu0 %990, %v585_v7   ;;  %716 = vperm.xlu1 %991, %v578_v35  }
 0x17e   : > { %761 = vperm.xlu0 %990, %v587_v9   ;;  %726 = vperm.xlu1 %991, %v580_v12  }
 0x182   : > { %771 = vperm.xlu0 %990, %v589_v53   ;;  %736 = vperm.xlu1 %991, %v582_v51  }
 0x186   : > { %781 = vperm.xlu0 %990, %v591_v37   ;;  %746 = vperm.xlu1 %991, %v584_v46  }
 0x18a   : > { %756 = vperm.xlu1 %991, %v586_v45  }
 0x18e   : > { %766 = vperm.xlu1 %991, %v588_v16  }
 0x192   : > { %776 = vperm.xlu1 %991, %v590_v63  }
 0x1c1   : > { %v595_v58 = vpop.permute.xlu0 %594 }
 0x1c2   : > { %v672_v56 = vmul.f32 %v595_v58, %v1072_v0  ;;  %v673_v37 = vmul.f32 %v595_v58, %v1075_v1 }
 0x1c5   : > { %v600_v54 = vpop.permute.xlu1 %599 }
 0x1c6   : > { %v674_v47 = vmul.f32 %v600_v54, %v1086_v5  ;;  %v675_v7 = vmul.f32 %v600_v54, %v1089_v6 }
 0x1c9   : > { %v605_v61 = vpop.permute.xlu1 %604 }
 0x1ca   : > { %v676_v1 = vmul.f32 %v605_v61, %v1078_v2 }
 0x1cd   : > { %v610_v59 = vpop.permute.xlu1 %609 }
 0x1ce   : > { %v678_v42 = vmul.f32 %v610_v59, %v1097_v10  ;;  %v679_v5 = vmul.f32 %v610_v59, %v1100_v11 }
 0x1d1   : > { %v1410_v43 = vpop.permute.xlu1 %614 }
 0x1d5   : > { %v620_v57 = vpop.permute.xlu1 %619  ;;  %v640_v13 = vpop.permute.xlu0 %639 }
 0x1d6   : > { %v682_v33 = vmul.f32 %v620_v57, %v1119_v20  ;;  %v683_v53 = vmul.f32 %v620_v57, %v1109_v15  ;;  %v691_v62 = vmul.f32 %v640_v13, %v1145_v31 }
 0x1d9   : > { %v1412_v30 = vpop.permute.xlu1 %624  ;;  %v1414_v27 = vpop.permute.xlu0 %649 }
 0x1dd   : > { %v630_v38 = vpop.permute.xlu1 %629  ;;  %v1416_v34 = vpop.permute.xlu0 %659 }
 0x1de   : > { %v686_v20 = vmul.f32 %v630_v38, %v1137_v28  ;;  %v687_v15 = vmul.f32 %v630_v38, %v1127_v23  ;;  %v677_v28 = vmul.f32 %v605_v61, %v1083_v4  ;;  %v690_v23 = vmul.f32 %v640_v13, %v1155_v36 }
 0x1df   : > { %v680_v61 = vmul.f32 %v1410_v43, %v1114_v18  ;;  %v681_v13 = vmul.f32 %v1410_v43, %v1106_v14  ;;  %v694_v38 = vmul.f32 %v1414_v27, %v1173_v44  ;;  %v684_v43 = vmul.f32 %v1412_v30, %v1132_v26 }
 0x1e1   : > { %v1418_v8 = vpop.permute.xlu1 %634  ;;  %v1420_v29 = vpop.permute.xlu0 %669 }
 0x1e5   : > { %v1424_v35 = vpop.permute.xlu1 %644  ;;  %v712_v41 = vpop.permute.xlu0 %711 }
 0x1e6   : > { %v786_v48 = vadd.f32 %v712_v41, %v674_v47  ;;  %v787_v17 = vadd.f32 %v712_v41, %v675_v7  ;;  %v695_v47 = vmul.f32 %v1414_v27, %v1163_v39  ;;  %v685_v27 = vmul.f32 %v1412_v30, %v1124_v22 }
 0x1e8   : > { %v818_v6 = vmax.f32 %v786_v48, 0.0  ;;  %v819_v9 = vmax.f32 %v787_v17, 0.0 }
 0x1e9   : > { %v1435_v12 = vpop.permute.xlu1 %654  ;;  %v722_v32 = vpop.permute.xlu0 %721 }
 0x1ea   : > { %850 = vst [vmem:[%s1431_s28 + $0x10] sm:$0xff] %v818_v6  ;;  %851 = vst.msk [vmem:[%s1431_s28 + $0x18] sm:$0xff] %vm255_vm0, %v819_v9  ;;  %v790_v3 = vadd.f32 %v722_v32, %v678_v42  ;;  %v791_v40 = vadd.f32 %v722_v32, %v679_v5  ;;  %v698_v6 = vmul.f32 %v1416_v34, %v1191_v52  ;;  %v1562_v9 = vld [vmem:[#allocation7_spill] sm:$0xff] }
 0x1eb   : > { %v699_v32 = vmul.f32 %v1416_v34, %v1562_v9  ;;  %v1563_v34 = vld [vmem:[#allocation3_spill] sm:$0xff] }
 0x1ec   : > { %v822_v51 = vmax.f32 %v790_v3, 0.0  ;;  %v823_v10 = vmax.f32 %v791_v40, 0.0 }
 0x1ed   : > { %v1442_v11 = vpop.permute.xlu1 %664  ;;  %v732_v19 = vpop.permute.xlu0 %731 }
 0x1ee   : > { %854 = vst [vmem:[%s1431_s28 + $0x30] sm:$0xff] %v822_v51  ;;  %855 = vst.msk [vmem:[%s1431_s28 + $0x38] sm:$0xff] %vm255_vm0, %v823_v10  ;;  %v794_v50 = vadd.f32 %v732_v19, %v682_v33  ;;  %v795_v21 = vadd.f32 %v732_v19, %v683_v53  ;;  %v688_v19 = vmul.f32 %v1418_v8, %v1563_v34 }
 0x1f0   : > { %v826_v46 = vmax.f32 %v794_v50, 0.0  ;;  %v827_v55 = vmax.f32 %v795_v21, 0.0  ;;  %v1564_v50 = vld [vmem:[#allocation2_spill] sm:$0xff] }
 0x1f1   : > { %v707_v25 = vpop.permute.xlu1 %706  ;;  %v742_v45 = vpop.permute.xlu0 %741  ;;  %v689_v21 = vmul.f32 %v1418_v8, %v1564_v50 }
 0x1f2   : > { %858 = vst [vmem:[%s1431_s28 + $0x50] sm:$0xff] %v826_v46  ;;  %859 = vst.msk [vmem:[%s1431_s28 + $0x58] sm:$0xff] %vm255_vm0, %v827_v55  ;;  %v784_v49 = vadd.f32 %v707_v25, %v672_v56  ;;  %v785_v60 = vadd.f32 %v707_v25, %v673_v37  ;;  %v798_v0 = vadd.f32 %v742_v45, %v686_v20  ;;  %v1565_v56 = vld [vmem:[#allocation12_spill] sm:$0xff]  ;;  %v1566_v20 = vld [vmem:[#allocation10_spill] sm:$0xff] }
 0x1f3   : > { %v799_v16 = vadd.f32 %v742_v45, %v687_v15  ;;  %v702_v37 = vmul.f32 %v1420_v29, %v1565_v56  ;;  %v703_v15 = vmul.f32 %v1420_v29, %v1566_v20 }
 0x1f4   : > { %v816_v24 = vmax.f32 %v784_v49, 0.0  ;;  %v817_v63 = vmax.f32 %v785_v60, 0.0  ;;  %v830_v54 = vmax.f32 %v798_v0, 0.0 }
 0x1f5   : > { %v831_v59 = vmax.f32 %v799_v16, 0.0  ;;  %v717_v58 = vpop.permute.xlu1 %716  ;;  %v752_v57 = vpop.permute.xlu0 %751 }
 0x1f6   : > { %848 = vst [vmem:[%s1431_s28] sm:$0xff] %v816_v24  ;;  %849 = vst.msk [vmem:[%s1431_s28 + $0x8] sm:$0xff] %vm255_vm0, %v817_v63  ;;  %v788_v2 = vadd.f32 %v717_v58, %v676_v1  ;;  %v789_v4 = vadd.f32 %v717_v58, %v677_v28  ;;  %v802_v36 = vadd.f32 %v752_v57, %v690_v23  ;;  %v1567_v1 = vld [vmem:[#allocation5_spill] sm:$0xff]  ;;  %v1568_v23 = vld [vmem:[#allocation4_spill] sm:$0xff] }
 0x1f7   : > { %862 = vst [vmem:[%s1431_s28 + $0x70] sm:$0xff] %v830_v54  ;;  %863 = vst.msk [vmem:[%s1431_s28 + $0x78] sm:$0xff] %vm255_vm0, %v831_v59  ;;  %v803_v31 = vadd.f32 %v752_v57, %v691_v62  ;;  %v692_v28 = vmul.f32 %v1424_v35, %v1567_v1  ;;  %v693_v62 = vmul.f32 %v1424_v35, %v1568_v23 }
 0x1f8   : > { %v820_v7 = vmax.f32 %v788_v2, 0.0  ;;  %v821_v41 = vmax.f32 %v789_v4, 0.0  ;;  %v834_v48 = vmax.f32 %v802_v36, 0.0  ;;  %v1569_v4 = vld [vmem:[#allocation8_spill] sm:$0xff]  ;;  %v1570_v36 = vld [vmem:[#allocation6_spill] sm:$0xff] }
 0x1f9   : > { %v835_v17 = vmax.f32 %v803_v31, 0.0  ;;  %v727_v42 = vpop.permute.xlu1 %726  ;;  %v762_v5 = vpop.permute.xlu0 %761  ;;  %v696_v35 = vmul.f32 %v1435_v12, %v1569_v4  ;;  %v697_v31 = vmul.f32 %v1435_v12, %v1570_v36 }
 0x1fa   : > { %852 = vst [vmem:[%s1431_s28 + $0x20] sm:$0xff] %v820_v7  ;;  %853 = vst.msk [vmem:[%s1431_s28 + $0x28] sm:$0xff] %vm255_vm0, %v821_v41  ;;  %v792_v14 = vadd.f32 %v727_v42, %v680_v61  ;;  %v793_v18 = vadd.f32 %v727_v42, %v681_v13  ;;  %v806_v44 = vadd.f32 %v762_v5, %v694_v38  ;;  %v1571_v41 = vld [vmem:[#allocation11_spill] sm:$0xff] }
 0x1fb   : > { %866 = vst [vmem:[%s1431_s28 + $0x90] sm:$0xff] %v834_v48  ;;  %867 = vst.msk [vmem:[%s1431_s28 + $0x98] sm:$0xff] %vm255_vm0, %v835_v17  ;;  %v807_v39 = vadd.f32 %v762_v5, %v695_v47  ;;  %v700_v48 = vmul.f32 %v1442_v11, %v1571_v41  ;;  %v1572_v17 = vld [vmem:[#allocation9_spill] sm:$0xff] }
 0x1fc   : > { %v824_v3 = vmax.f32 %v792_v14, 0.0  ;;  %v825_v40 = vmax.f32 %v793_v18, 0.0  ;;  %v838_v33 = vmax.f32 %v806_v44, 0.0  ;;  %v701_v42 = vmul.f32 %v1442_v11, %v1572_v17 }
 0x1fd   : > { %v839_v53 = vmax.f32 %v807_v39, 0.0  ;;  %v737_v51 = vpop.permute.xlu1 %736  ;;  %v772_v10 = vpop.permute.xlu0 %771 }
 0x1fe   : > { %856 = vst [vmem:[%s1431_s28 + $0x40] sm:$0xff] %v824_v3  ;;  %857 = vst.msk [vmem:[%s1431_s28 + $0x48] sm:$0xff] %vm255_vm0, %v825_v40  ;;  %v796_v22 = vadd.f32 %v737_v51, %v684_v43  ;;  %v797_v26 = vadd.f32 %v737_v51, %v685_v27  ;;  %v810_v52 = vadd.f32 %v772_v10, %v698_v6 }
 0x1ff   : > { %870 = vst [vmem:[%s1431_s28 + $0xb0] sm:$0xff] %v838_v33  ;;  %871 = vst.msk [vmem:[%s1431_s28 + $0xb8] sm:$0xff] %vm255_vm0, %v839_v53  ;;  %v811_v30 = vadd.f32 %v772_v10, %v699_v32 }
 0x200   : > { %v828_v46 = vmax.f32 %v796_v22, 0.0  ;;  %v829_v55 = vmax.f32 %v797_v26, 0.0  ;;  %v842_v25 = vmax.f32 %v810_v52, 0.0 }
 0x201   : > { %v843_v45 = vmax.f32 %v811_v30, 0.0  ;;  %v747_v49 = vpop.permute.xlu1 %746  ;;  %v782_v60 = vpop.permute.xlu0 %781 }
 0x202   : > { %860 = vst [vmem:[%s1431_s28 + $0x60] sm:$0xff] %v828_v46  ;;  %861 = vst.msk [vmem:[%s1431_s28 + $0x68] sm:$0xff] %vm255_vm0, %v829_v55  ;;  %v800_v8 = vadd.f32 %v747_v49, %v688_v19  ;;  %v801_v0 = vadd.f32 %v747_v49, %v689_v21  ;;  %v814_v16 = vadd.f32 %v782_v60, %v702_v37 }
 0x203   : > { %874 = vst [vmem:[%s1431_s28 + $0xd0] sm:$0xff] %v842_v25  ;;  %875 = vst.msk [vmem:[%s1431_s28 + $0xd8] sm:$0xff] %vm255_vm0, %v843_v45  ;;  %v815_v29 = vadd.f32 %v782_v60, %v703_v15 }
 0x204   : > { %v832_v24 = vmax.f32 %v800_v8, 0.0  ;;  %v833_v63 = vmax.f32 %v801_v0, 0.0  ;;  %v846_v54 = vmax.f32 %v814_v16, 0.0 }
 0x205   : > { %v847_v59 = vmax.f32 %v815_v29, 0.0  ;;  %v757_v58 = vpop.permute.xlu1 %756 }
 0x206   : > { %864 = vst [vmem:[%s1431_s28 + $0x80] sm:$0xff] %v832_v24  ;;  %865 = vst.msk [vmem:[%s1431_s28 + $0x88] sm:$0xff] %vm255_vm0, %v833_v63  ;;  %v804_v57 = vadd.f32 %v757_v58, %v692_v28  ;;  %v805_v2 = vadd.f32 %v757_v58, %v693_v62 }
 0x207   : > { %878 = vst [vmem:[%s1431_s28 + $0xf0] sm:$0xff] %v846_v54  ;;  %879 = vst.msk [vmem:[%s1431_s28 + $0xf8] sm:$0xff] %vm255_vm0, %v847_v59 }
 0x208   : > { %v836_v61 = vmax.f32 %v804_v57, 0.0  ;;  %v837_v13 = vmax.f32 %v805_v2, 0.0 }
 0x209   : > { %v767_v38 = vpop.permute.xlu1 %766 }
 0x20a   : > { %868 = vst [vmem:[%s1431_s28 + $0xa0] sm:$0xff] %v836_v61  ;;  %869 = vst.msk [vmem:[%s1431_s28 + $0xa8] sm:$0xff] %vm255_vm0, %v837_v13  ;;  %v808_v47 = vadd.f32 %v767_v38, %v696_v35  ;;  %v809_v7 = vadd.f32 %v767_v38, %v697_v31 }
 0x20c   : > { %v840_v5 = vmax.f32 %v808_v47, 0.0  ;;  %v841_v14 = vmax.f32 %v809_v7, 0.0 }
 0x20d   : > { %v777_v18 = vpop.permute.xlu1 %776 }
 0x20e   : > { %872 = vst [vmem:[%s1431_s28 + $0xc0] sm:$0xff] %v840_v5  ;;  %873 = vst.msk [vmem:[%s1431_s28 + $0xc8] sm:$0xff] %vm255_vm0, %v841_v14  ;;  %v812_v12 = vadd.f32 %v777_v18, %v700_v48  ;;  %v813_v44 = vadd.f32 %v777_v18, %v701_v42 }
 0x210   : > { %v844_v39 = vmax.f32 %v812_v12, 0.0  ;;  %v845_v43 = vmax.f32 %v813_v44, 0.0 }
 0x212   : > { %876 = vst [vmem:[%s1431_s28 + $0xe0] sm:$0xff] %v844_v39  ;;  %877 = vst.msk [vmem:[%s1431_s28 + $0xe8] sm:$0xff] %vm255_vm0, %v845_v43 }
 0x213 PF: > { %s13_s12 = sadd.s32 1, %s1030_s12  }
 0x214   : > { %p10_p4 = scmp.ge.s32.totalorder %s13_s12, 6  }
 0x216   :  { %12 = sbr.rel (!%p10_p4) target bundleno = 1 (0x1), region = 68 }

</bundles_post_ra>
